<compile_context>
chip_gen: v7x
topology: tpu7x:2x2x1
jax: 0.10.0
libtpu: 0.0.40
codegen_flags: <defaults>
</compile_context>

<pallas_src>
import functools
import numpy as np
import jax
import jax.numpy as jnp
from jax.experimental import pallas as pl
from jax.experimental.pallas import tpu as pltpu


# ----------------------------------------------------------------------------
# Trace-time constants: PyTorch AdaptiveAvgPool2d bin boundaries and the
# transposed pooling matrix P^T (H*W, S*S) such that
#   pooled(C, S*S) = x(C, H*W) @ P^T,  with bin r = i*S + j  (PyTorch ordering).
# ----------------------------------------------------------------------------
def _adaptive_bins(in_size: int, out_size: int):
    """PyTorch adaptive pooling bins: [floor(i*L/S), ceil((i+1)*L/S))."""
    return [
        (i * in_size // out_size, -((-(i + 1) * in_size) // out_size))
        for i in range(out_size)
    ]


def _pool_matrix_t(H: int, W: int, S: int) -> np.ndarray:
    hb = _adaptive_bins(H, S)
    wb = _adaptive_bins(W, S)
    mat = np.zeros((S * S, H * W), np.float32)
    for i, (hs, he) in enumerate(hb):
        for j, (ws, we) in enumerate(wb):
            r = i * S + j
            val = 1.0 / float((he - hs) * (we - ws))
            for h in range(hs, he):
                mat[r, h * W + ws:h * W + we] = val
    return np.ascontiguousarray(mat.T)          # (H*W, S*S)


def _choose_block_hw(HW: int, C: int, target_bytes: int = 2 << 20) -> int:
    """Largest multiple-of-128 divisor of HW whose (C, tk) f32 block fits the
    target; falls back to the smallest such divisor, else the full extent."""
    best = 0
    smallest = 0
    k = 128
    while k <= HW:
        if HW % k == 0:
            if smallest == 0:
                smallest = k
            if C * k * 4 <= target_bytes:
                best = k
        k += 128
    if best:
        return best
    if smallest:
        return smallest
    return HW


# ----------------------------------------------------------------------------
# Fused kernel: channel-major pooling matmul (accumulated over H*W tiles),
# tiny in-kernel transpose, L2-normalize, lane-dense store.
# ----------------------------------------------------------------------------
def _reshapef_kernel(x_ref, pt_ref, o_ref, acc_ref):
    k = pl.program_id(1)

    @pl.when(k == 0)
    def _():
        acc_ref[...] = jnp.zeros_like(acc_ref)

    # x_ref: (1, C, tk) slice of the NCHW input (free channel-major view).
    # pt_ref: (tk, S*S) slice of the pooling-matrix transpose.
    # MXU shape: M = C (large), K = tk, N = S*S.
    acc_ref[...] += jnp.dot(x_ref[0], pt_ref[...],
                            preferred_element_type=jnp.float32)

    @pl.when(k == pl.num_programs(1) - 1)
    def _():
        pooled = jnp.transpose(acc_ref[...], (1, 0))        # (S*S, C) tiny XLU op
        norm = jnp.sqrt(jnp.sum(pooled * pooled, axis=-1, keepdims=True))
        # PyTorch Normalize(2): x / (||x|| + 1e-7)
        o_ref[...] = pooled * pl.reciprocal(norm + 1e-7, approx=False)


def reshapef_forward(x_nchw, out_size: int = 4, block_hw: int | None = None):
    """x_nchw: (N, C, H, W) -> (N*out_size*out_size, C), L2-normalized rows."""
    N, C, H, W = x_nchw.shape
    S = out_size
    HW = H * W

    # Free view: contiguous NCHW -> (N, C, H*W). No transpose, no extra HBM pass.
    x = x_nchw.astype(jnp.float32).reshape(N, C, HW)
    pool_t = jnp.asarray(_pool_matrix_t(H, W, S))            # (H*W, S*S) constant

    tk = block_hw if block_hw is not None else _choose_block_hw(HW, C)
    assert HW % tk == 0 and (tk % 128 == 0 or tk == HW), (HW, tk)
    kt = HW // tk

    # VMEM budget: double-buffered x / P^T / out blocks + accumulator + headroom.
    x_blk = C * tk * 4
    pt_blk = tk * S * S * 4
    out_blk = S * S * C * 4
    acc_blk = C * S * S * 4
    working = 2 * (x_blk + pt_blk + out_blk) + acc_blk
    vmem_limit = int(min(56 << 20, max(2 * working + (4 << 20), 16 << 20)))

    flops = 2 * N * C * HW * S * S
    bytes_accessed = 4 * (N * C * HW + HW * S * S + N * S * S * C)

    out = pl.pallas_call(
        _reshapef_kernel,
        out_shape=jax.ShapeDtypeStruct((N * S * S, C), jnp.float32),
        grid_spec=pltpu.PrefetchScalarGridSpec(
            num_scalar_prefetch=0,
            grid=(N, kt),                                   # reduction axis last
            in_specs=[
                # one (C, tk) channel-major slab of batch element n per step
                pl.BlockSpec((1, C, tk), lambda n, k: (n, 0, k)),
                # matching (tk, S*S) slice of the pooling matrix transpose
                pl.BlockSpec((tk, S * S), lambda n, k: (k, 0)),
            ],
            # same output block across k -> stays resident; written at k==last
            out_specs=pl.BlockSpec((S * S, C), lambda n, k: (n, 0)),
            scratch_shapes=[pltpu.VMEM((C, S * S), jnp.float32)],
        ),
        compiler_params=pltpu.CompilerParams(
            dimension_semantics=("parallel", "arbitrary"),
            vmem_limit_bytes=vmem_limit),
        cost_estimate=pl.CostEstimate(
            flops=flops, transcendentals=0, bytes_accessed=bytes_accessed),
    )(x, pool_t)
    return out


# ----------------------------------------------------------------------------
# Pure-JAX reference (independent code path) for correctness checking.
# ----------------------------------------------------------------------------
def _reshapef_reference(x_nchw, out_size: int = 4):
    N, C, H, W = x_nchw.shape
    S = out_size
    x = jnp.transpose(x_nchw.astype(jnp.float32), (0, 2, 3, 1))   # NHWC
    hb = _adaptive_bins(H, S)
    wb = _adaptive_bins(W, S)
    rows = []
    for (hs, he) in hb:
        for (ws, we) in wb:
            rows.append(jnp.mean(x[:, hs:he, ws:we, :], axis=(1, 2)))   # (N, C)
    pooled = jnp.stack(rows, axis=1).reshape(N * S * S, C)
    norm = jnp.sqrt(jnp.sum(pooled * pooled, axis=1, keepdims=True))
    return pooled / (norm + 1e-7)


# ----------------------------------------------------------------------------
if __name__ == "__main__":
    key = jax.random.PRNGKey(0)
    k0, k1 = jax.random.split(key)

    # Primary test: feature-map-like input, auto block size (single k step).
    x = jax.random.normal(k0, (2, 128, 16, 16), jnp.float32)
    fwd = jax.jit(reshapef_forward)
    out = jax.block_until_ready(fwd(x))
    assert out.shape == (2 * 16, 128), out.shape
    assert bool(jnp.all(jnp.isfinite(out)))
    ref = _reshapef_reference(x)
    assert bool(jnp.allclose(out, ref, rtol=1e-5, atol=1e-5)), \
        float(jnp.max(jnp.abs(out - ref)))

    # Forced contraction split (tk=128 -> 2 k-steps) exercises the
    # accumulate / init / finalize pipeline path.
    fwd_split = jax.jit(functools.partial(reshapef_forward, block_hw=128))
    out_s = jax.block_until_ready(fwd_split(x))
    assert bool(jnp.allclose(out_s, ref, rtol=1e-5, atol=1e-5)), \
        float(jnp.max(jnp.abs(out_s - ref)))

    # Non-divisible spatial sizes + non-128 channel count: exercises the
    # general adaptive-pooling bins and the full-extent (ragged) block path.
    x2 = jax.random.normal(k1, (3, 48, 10, 14), jnp.float32)
    out2 = jax.block_until_ready(jax.jit(reshapef_forward)(x2))
    assert out2.shape == (3 * 16, 48), out2.shape
    ref2 = _reshapef_reference(x2)
    assert bool(jnp.allclose(out2, ref2, rtol=1e-5, atol=1e-5)), \
        float(jnp.max(jnp.abs(out2 - ref2)))

    print("KERNEL_OK")
</pallas_src>

<mosaic_0001>
module attributes {stable_mosaic.version = 11 : i64} {
  func.func @_reshapef_kernel(%arg0: i32, %arg1: i32, %arg2: memref<1x128x256xf32, #tpu.memory_space<vmem>>, %arg3: memref<256x16xf32, #tpu.memory_space<vmem>>, %arg4: memref<16x128xf32, #tpu.memory_space<vmem>>, %arg5: memref<128x16xf32, #tpu.memory_space<vmem>>) attributes {dimension_semantics = [#tpu.dimension_semantics<parallel>, #tpu.dimension_semantics<arbitrary>], iteration_bounds = array<i64: 2, 1>, scalar_prefetch = 0 : i64, scratch_operands = 1 : i64, tpu.core_type = #tpu.core_type<tc>, window_params = [{transform_indices = @transform_0, window_bounds = array<i64: 1, 128, 256>}, {transform_indices = @transform_1, window_bounds = array<i64: 256, 16>}, {transform_indices = @transform_2, window_bounds = array<i64: 16, 128>}]} {
    %c0_i32 = arith.constant 0 : i32
    %0 = arith.cmpi eq, %arg1, %c0_i32 : i32
    %1 = arith.extui %0 : i1 to i32
    %c0_i32_0 = arith.constant 0 : i32
    %2 = arith.cmpi ne, %1, %c0_i32_0 : i32
    scf.if %2 {
      %cst_11 = arith.constant 0.000000e+00 : f32
      %13 = vector.broadcast %cst_11 : f32 to vector<128x16xf32>
      %c0_12 = arith.constant 0 : index
      %c0_13 = arith.constant 0 : index
      %14 = vector.load %arg5[%c0_12, %c0_13] : memref<128x16xf32, #tpu.memory_space<vmem>>, vector<128x16xf32>
      tpu.vector_store %arg5[%c0_12, %c0_13], %13 {strides = array<i32>} : memref<128x16xf32, #tpu.memory_space<vmem>>, vector<128x16xf32>,
    } else {
    }
    %c0 = arith.constant 0 : index
    %c0_1 = arith.constant 0 : index
    %3 = vector.load %arg5[%c0, %c0_1] : memref<128x16xf32, #tpu.memory_space<vmem>>, vector<128x16xf32>
    %c0_2 = arith.constant 0 : index
    %c0_3 = arith.constant 0 : index
    %c0_4 = arith.constant 0 : index
    %4 = vector.load %arg2[%c0_2, %c0_3, %c0_4] : memref<1x128x256xf32, #tpu.memory_space<vmem>>, vector<1x128x256xf32>
    %5 = vector.shape_cast %4 : vector<1x128x256xf32> to vector<128x256xf32>
    %c0_5 = arith.constant 0 : index
    %c0_6 = arith.constant 0 : index
    %6 = vector.load %arg3[%c0_5, %c0_6] : memref<256x16xf32, #tpu.memory_space<vmem>>, vector<256x16xf32>
    %cst = arith.constant dense<0.000000e+00> : vector<128x16xf32>
    %7 = tpu.matmul %5, %6, %cst {dimension_numbers = #tpu.dot_dimension_numbers<[1], [0], [0], [1], [0, 0, 1, 1], [], []>} : vector<128x256xf32>, vector<256x16xf32>, vector<128x16xf32> -> vector<128x16xf32>
    %8 = arith.addf %3, %7 : vector<128x16xf32>
    %c0_7 = arith.constant 0 : index
    %c0_8 = arith.constant 0 : index
    %9 = vector.load %arg5[%c0_7, %c0_8] : memref<128x16xf32, #tpu.memory_space<vmem>>, vector<128x16xf32>
    tpu.vector_store %arg5[%c0_7, %c0_8], %8 {strides = array<i32>} : memref<128x16xf32, #tpu.memory_space<vmem>>, vector<128x16xf32>,
    %c0_i32_9 = arith.constant 0 : i32
    %10 = arith.cmpi eq, %arg1, %c0_i32_9 : i32
    %11 = arith.extui %10 : i1 to i32
    %c0_i32_10 = arith.constant 0 : i32
    %12 = arith.cmpi ne, %11, %c0_i32_10 : i32
    scf.if %12 {
      %c0_11 = arith.constant 0 : index
      %c0_12 = arith.constant 0 : index
      %13 = vector.load %arg5[%c0_11, %c0_12] : memref<128x16xf32, #tpu.memory_space<vmem>>, vector<128x16xf32>
      %14 = tpu.transpose %13, [1, 0] : vector<128x16xf32> -> vector<16x128xf32>
      %15 = arith.mulf %14, %14 : vector<16x128xf32>
      %cst_13 = arith.constant dense<0.000000e+00> : vector<16xf32>
      %16 = vector.multi_reduction <add>, %15, %cst_13 [1] : vector<16x128xf32> to vector<16xf32>
      %17 = vector.shape_cast %16 : vector<16xf32> to vector<16x1xf32>
      %18 = math.sqrt %17 : vector<16x1xf32>
      %cst_14 = arith.constant 1.000000e-07 : f32
      %19 = vector.broadcast %cst_14 : f32 to vector<16x1xf32>
      %20 = arith.addf %18, %19 : vector<16x1xf32>
      %21 = tpu.reciprocal %20 : vector<16x1xf32> -> vector<16x1xf32>
      %22 = vector.broadcast %21 : vector<16x1xf32> to vector<16x128xf32>
      %23 = arith.mulf %14, %22 : vector<16x128xf32>
      %c0_15 = arith.constant 0 : index
      %c0_16 = arith.constant 0 : index
      %24 = vector.load %arg4[%c0_15, %c0_16] : memref<16x128xf32, #tpu.memory_space<vmem>>, vector<16x128xf32>
      tpu.vector_store %arg4[%c0_15, %c0_16], %23 {strides = array<i32>} : memref<16x128xf32, #tpu.memory_space<vmem>>, vector<16x128xf32>,
    } else {
    }
    return
  }
  func.func @transform_0(%arg0: i32, %arg1: i32) -> (i32, i32, i32) {
    %c0_i32 = arith.constant 0 : i32
    %c0_i32_0 = arith.constant 0 : i32
    return %arg0, %c0_i32, %arg1 : i32, i32, i32
  }
  func.func @transform_1(%arg0: i32, %arg1: i32) -> (i32, i32) {
    %c0_i32 = arith.constant 0 : i32
    %c0_i32_0 = arith.constant 0 : i32
    return %arg1, %c0_i32 : i32, i32
  }
  func.func @transform_2(%arg0: i32, %arg1: i32) -> (i32, i32) {
    %c0_i32 = arith.constant 0 : i32
    %c0_i32_0 = arith.constant 0 : i32
    return %arg0, %c0_i32 : i32, i32
  }
}

</mosaic_0001>

<bundles_post_ra>
// kernel: reshapef_forward.1
= control target key start
LH: loop header
LB: loop body
LE: loop exit
PB: predicated region body
PF: predicated region fallthrough
CT: control target
= control target key end

     0   :  { %7 = vsyncpa [#allocation4], 0  ;;  %s1242_s0 = inlined_call_operand.vmem [shape: f32[2,128,256], index: 0, kind: input, shape index: {}]   ;;  %s1243_s1 = inlined_call_operand.vmem [shape: f32[256,16], index: 1, kind: input, shape index: {}]   ;;  %s1244_s2 = inlined_call_operand.hbm [shape: f32[32,128], index: 2, kind: output, shape index: {}]  }
   0x1   :  { %9 = vsyncpa [#allocation4 + $0x1], 0  ;;  %s965_s9 = smov 0   ;;  %s967_s10 = smov 0  }
   0x2   :  { %s969_s11 = smov 0   ;;  %s971_s12 = smov 0  }
   0x3   :  { %s973_s13 = smov 0   ;;  %s975_s14 = smov 0  }
   0x4 LB: > { %s656_s15 = sadd.s32 4294967295, %s944_s14   ;;  %s657_s16 = sadd.s32 4294967294, %s944_s14   ;;  %s944_s14 = sphi %s975_s14, %s15_s14   ;;  %s940_s13 = sphi %s973_s13, %s1251_s13   ;;  %s936_s12 = sphi %s971_s12, %s1250_s12   ;;  %s932_s11 = sphi %s969_s11, %s1249_s11   ;;  %s928_s10 = sphi %s967_s10, %s1248_s10   ;;  %s924_s9 = sphi %s965_s9, %s1247_s9  }
   0x5   : > { %s27_s17 = sadd.s32 1, %s940_s13  ;;  %s88_s18 = sadd.s32 1, %s932_s11 }
   0x6   : > { %p29_p0 = scmp.ge.s32.totalorder %s27_s17, 2  ;;  %p98_p1 = scmp.ne.s32.totalorder %s932_s11, %s928_s10 }
   0x7   : > { %p99_p2 = scmp.eq.s32.totalorder %s656_s15, 1  ;;  %p104_p3 = scmp.ne.s32.totalorder %s928_s10, %s924_s9 }
   0x8   : > { %s1253_s17 = smov (%p29_p0, %s27_s17), 0  ;;  %p105_p5 = scmp.eq.s32.totalorder %s657_s16, 1 }
   0x9   : > { %p1005_p4 = por %p99_p2, %p98_p1  ;;  %s85_s20 = ssub.s32 %s940_s13, %s1253_s17 }
   0xa   : > { %p661_p6 = scmp.ge.s32.totalorder %s944_s14, 1  ;;  %p86_p7 = scmp.eq.s32.totalorder %s85_s20, 0 }
   0xb   : > { %p1012_p8 = por %p105_p5, %p104_p3  ;;  %p145_p9 = scmp.lt.s32.totalorder %s944_s14, 3 }
   0xc   : > { %s1018_s22 = scalar_select %p86_p7, %s932_s11, %s88_s18  }
   0xd   : > { %p146_p10 = pnand %p661_p6, %p145_p9 }
   0xe   : > { %v278_v0 = vld [vmem:[%s1243_s1 + $0x80] sm:$0xff] (!%p146_p10)  ;;  %v279_v1 = vld [vmem:[%s1243_s1 + $0x88] sm:$0xff] (!%p146_p10)  ;;  %p177_p11 = scmp.lt.s32.totalorder (!%p146_p10), %s936_s12, 1  ;;  %v280_v5 = vld [vmem:[%s1243_s1 + $0x90] sm:$0xff] (!%p146_p10)  ;;  %vm197_vm0 = vcmask (!%p146_p10), 130048  }
   0xf   : > { %149 = sbr.rel (%p146_p10) target bundleno = 596 (0x254), region = 28  ;;  %v262_v2 = vld [vmem:[%s1243_s1] sm:$0xff] (!%p146_p10)  ;;  %v752_v3 = vpack.c.bf16 (!%p146_p10), %v279_v1, %v278_v0  ;;  %v263_v4 = vld [vmem:[%s1243_s1 + $0x8] sm:$0xff] (!%p146_p10)  ;;  %v281_v6 = vld [vmem:[%s1243_s1 + $0x98] sm:$0xff] (!%p146_p10) }
  0x10   : > { %v754_v7 = vpack.c.bf16 (!%p146_p10), %v263_v4, %v262_v2  ;;  %v756_v8 = vpack.c.bf16 (!%p146_p10), %v281_v6, %v280_v5  ;;  %v264_v9 = vld [vmem:[%s1243_s1 + $0x10] sm:$0xff] (!%p146_p10)  ;;  %v265_v10 = vld [vmem:[%s1243_s1 + $0x18] sm:$0xff] (!%p146_p10)  ;;  %v282_v11 = vld [vmem:[%s1243_s1 + $0xa0] sm:$0xff] (!%p146_p10) }
  0x11   : > { %753 = vmatprep.subr.bf16.mxu0 (!%p146_p10), %v752_v3  ;;  %v283_v12 = vld [vmem:[%s1243_s1 + $0xa8] sm:$0xff] (!%p146_p10)  ;;  %784 = vmatprep.subr.bf16.mxu1 (!%p146_p10), %v752_v3  ;;  %v758_v13 = vpack.c.bf16 (!%p146_p10), %v265_v10, %v264_v9  ;;  %v266_v15 = vld [vmem:[%s1243_s1 + $0x20] sm:$0xff] (!%p146_p10)  ;;  %v284_v17 = vld [vmem:[%s1243_s1 + $0xb0] sm:$0xff] (!%p146_p10) }
  0x12   : > { %755 = vmatpush3.bf16.msra.mxu0 (!%p146_p10), %v754_v7  ;;  %792 = vmatpush3.bf16.msra.mxu1 (!%p146_p10), %v754_v7  ;;  %v760_v14 = vpack.c.bf16 (!%p146_p10), %v283_v12, %v282_v11  ;;  %v267_v16 = vld [vmem:[%s1243_s1 + $0x28] sm:$0xff] (!%p146_p10)  ;;  %v285_v18 = vld [vmem:[%s1243_s1 + $0xb8] sm:$0xff] (!%p146_p10)  ;;  %v268_v21 = vld [vmem:[%s1243_s1 + $0x30] sm:$0xff] (!%p146_p10) }
  0x13   : > { %757 = vmatprep.subr.bf16.mxu0 (!%p146_p10), %v756_v8  ;;  %785 = vmatprep.subr.bf16.mxu1 (!%p146_p10), %v756_v8  ;;  %v762_v19 = vpack.c.bf16 (!%p146_p10), %v267_v16, %v266_v15  ;;  %v764_v20 = vpack.c.bf16 (!%p146_p10), %v285_v18, %v284_v17  ;;  %v269_v22 = vld [vmem:[%s1243_s1 + $0x38] sm:$0xff] (!%p146_p10)  ;;  %v286_v23 = vld [vmem:[%s1243_s1 + $0xc0] sm:$0xff] (!%p146_p10)  ;;  %v287_v24 = vld [vmem:[%s1243_s1 + $0xc8] sm:$0xff] (!%p146_p10)  ;;  %v946_v16 = vmov (!%p146_p10), 0.0  }
  0x14   : > { %v766_v26 = vpack.c.bf16 (!%p146_p10), %v269_v22, %v268_v21  ;;  %v768_v27 = vpack.c.bf16 (!%p146_p10), %v287_v24, %v286_v23  ;;  %v270_v28 = vld [vmem:[%s1243_s1 + $0x40] sm:$0xff] (!%p146_p10)  ;;  %v271_v29 = vld [vmem:[%s1243_s1 + $0x48] sm:$0xff] (!%p146_p10)  ;;  %v288_v30 = vld [vmem:[%s1243_s1 + $0xd0] sm:$0xff] (!%p146_p10)  ;;  %198 = vst.msk [vmem:[#allocation2] sm:$0xff] (!%p146_p10), %vm197_vm0, %v946_v16 }
  0x15   : > { %v289_v31 = vld [vmem:[%s1243_s1 + $0xd8] sm:$0xff] (!%p146_p10)  ;;  %v770_v32 = vpack.c.bf16 (!%p146_p10), %v271_v29, %v270_v28  ;;  %v272_v35 = vld [vmem:[%s1243_s1 + $0x50] sm:$0xff] (!%p146_p10)  ;;  %v290_v37 = vld [vmem:[%s1243_s1 + $0xe0] sm:$0xff] (!%p146_p10)  ;;  %199 = vst.msk [vmem:[#allocation2 + $0x8] sm:$0xff] (!%p146_p10), %vm197_vm0, %v946_v16 }
  0x16   : > { %s178_s23 = scalar_select %p177_p11, %s936_s12, 1  ;;  %759 = vmatpush3.bf16.msra.mxu0 %v758_v13  ;;  %793 = vmatpush3.bf16.msra.mxu1 %v758_v13  ;;  %v772_v34 = vpack.c.bf16 %v289_v31, %v288_v30  ;;  %v273_v36 = vld [vmem:[%s1243_s1 + $0x58] sm:$0xff]  ;;  %v291_v38 = vld [vmem:[%s1243_s1 + $0xe8] sm:$0xff]  ;;  %v274_v41 = vld [vmem:[%s1243_s1 + $0x60] sm:$0xff]  ;;  %200 = vst.msk [vmem:[#allocation2 + $0x10] sm:$0xff] %vm197_vm0, %v946_v16 }
  0x17   : > { %761 = vmatprep.subr.bf16.mxu0 %v760_v14  ;;  %786 = vmatprep.subr.bf16.mxu1 %v760_v14  ;;  %v774_v39 = vpack.c.bf16 %v273_v36, %v272_v35  ;;  %v776_v40 = vpack.c.bf16 %v291_v38, %v290_v37  ;;  %v275_v42 = vld [vmem:[%s1243_s1 + $0x68] sm:$0xff]  ;;  %v292_v43 = vld [vmem:[%s1243_s1 + $0xf0] sm:$0xff]  ;;  %v293_v44 = vld [vmem:[%s1243_s1 + $0xf8] sm:$0xff]  ;;  %201 = vst.msk [vmem:[#allocation2 + $0x18] sm:$0xff] %vm197_vm0, %v946_v16 }
  0x18   : > { %s670_s26 = sshll.u32 %s178_s23, 8  ;;  %v778_v45 = vpack.c.bf16 %v275_v42, %v274_v41  ;;  %v780_v46 = vpack.c.bf16 %v293_v44, %v292_v43  ;;  %v276_v47 = vld [vmem:[%s1243_s1 + $0x70] sm:$0xff]  ;;  %v277_v48 = vld [vmem:[%s1243_s1 + $0x78] sm:$0xff]  ;;  %202 = vst.msk [vmem:[#allocation2 + $0x20] sm:$0xff] %vm197_vm0, %v946_v16  ;;  %203 = vst.msk [vmem:[#allocation2 + $0x28] sm:$0xff] %vm197_vm0, %v946_v16  ;;  %s671_s23 = sshll.u32 %s936_s12, 8 }
  0x19   : > { %s1067_s15 = scalar_lea.vmem %s1242_s0, %s670_s26  ;;  %v782_v49 = vpack.c.bf16 %v277_v48, %v276_v47  ;;  %204 = vst.msk [vmem:[#allocation2 + $0x30] sm:$0xff] %vm197_vm0, %v946_v16  ;;  %205 = vst.msk [vmem:[#allocation2 + $0x38] sm:$0xff] %vm197_vm0, %v946_v16  ;;  %s1192_s28 = scalar_lea.hbm %s1244_s2, %s671_s23 }
  0x1a   : > { %v231_v25 = vld [vmem:[%s1067_s15 + $0x8] sm:$0xff]  ;;  %763 = vmatpush3.bf16.msra.mxu0 %v762_v19  ;;  %794 = vmatpush3.bf16.msra.mxu1 %v762_v19  ;;  %v230_v50 = vld [vmem:[%s1067_s15] sm:$0xff]  ;;  %v233_v52 = vld [vmem:[%s1067_s15 + $0x18] sm:$0xff]  ;;  %206 = vst.msk [vmem:[#allocation2 + $0x40] sm:$0xff] %vm197_vm0, %v946_v16  ;;  %s947_s12 = smov [#allocation3]  }
  0x1b   : > { %358 = vmatprep.mubr.f32.mxu0 %v231_v25  ;;  %765 = vmatprep.subr.bf16.mxu0 %v764_v20  ;;  %v247_v33 = vld [vmem:[%s1067_s15 + $0x88] sm:$0xff]  ;;  %v246_v51 = vld [vmem:[%s1067_s15 + $0x80] sm:$0xff]  ;;  %v249_v53 = vld [vmem:[%s1067_s15 + $0x98] sm:$0xff]  ;;  %207 = vst.msk [vmem:[#allocation2 + $0x48] sm:$0xff] %vm197_vm0, %v946_v16  ;;  %s870_s3 = sshll.u32 %s947_s12, 4  ;;  %s871_s3 = int_to_ptr.vmem [resolvable:$false] %s870_s3 }
  0x1c   : > { %787 = vmatprep.subr.bf16.mxu1 %v764_v20  ;;  %398 = vmatprep.mubr.f32.mxu1 %v247_v33  ;;  %v232_v54 = vld [vmem:[%s1067_s15 + $0x10] sm:$0xff]  ;;  %v235_v56 = vld [vmem:[%s1067_s15 + $0x28] sm:$0xff]  ;;  %v234_v58 = vld [vmem:[%s1067_s15 + $0x20] sm:$0xff]  ;;  %208 = vst.msk [vmem:[#allocation2 + $0x50] sm:$0xff] %vm197_vm0, %v946_v16  ;;  %s872_s4 = scalar_lea.vmem %s871_s3, 512 }
  0x1d   : > { %v248_v55 = vld [vmem:[%s1067_s15 + $0x90] sm:$0xff]  ;;  %v251_v57 = vld [vmem:[%s1067_s15 + $0xa8] sm:$0xff]  ;;  %v250_v59 = vld [vmem:[%s1067_s15 + $0xa0] sm:$0xff]  ;;  %209 = vst.msk [vmem:[#allocation2 + $0x58] sm:$0xff] %vm197_vm0, %v946_v16 }
  0x1e   : > { %767 = vmatpush3.bf16.msra.mxu0 %v766_v26  ;;  %795 = vmatpush3.bf16.msra.mxu1 %v766_v26  ;;  %v237_v60 = vld [vmem:[%s1067_s15 + $0x38] sm:$0xff]  ;;  %v236_v62 = vld [vmem:[%s1067_s15 + $0x30] sm:$0xff]  ;;  %v239_v0 = vld [vmem:[%s1067_s15 + $0x48] sm:$0xff]  ;;  %210 = vst.msk [vmem:[#allocation2 + $0x60] sm:$0xff] %vm197_vm0, %v946_v16 }
  0x1f   : > { %769 = vmatprep.subr.bf16.mxu0 %v768_v27  ;;  %788 = vmatprep.subr.bf16.mxu1 %v768_v27  ;;  %v253_v61 = vld [vmem:[%s1067_s15 + $0xb8] sm:$0xff]  ;;  %v252_v63 = vld [vmem:[%s1067_s15 + $0xb0] sm:$0xff]  ;;  %v255_v1 = vld [vmem:[%s1067_s15 + $0xc8] sm:$0xff]  ;;  %211 = vst.msk [vmem:[#allocation2 + $0x68] sm:$0xff] %vm197_vm0, %v946_v16 }
  0x20   : > { %v238_v2 = vld [vmem:[%s1067_s15 + $0x40] sm:$0xff]  ;;  %v241_v4 = vld [vmem:[%s1067_s15 + $0x58] sm:$0xff]  ;;  %v240_v6 = vld [vmem:[%s1067_s15 + $0x50] sm:$0xff]  ;;  %212 = vst.msk [vmem:[#allocation2 + $0x70] sm:$0xff] %vm197_vm0, %v946_v16 }
  0x21   : > { %v254_v3 = vld [vmem:[%s1067_s15 + $0xc0] sm:$0xff]  ;;  %v257_v5 = vld [vmem:[%s1067_s15 + $0xd8] sm:$0xff]  ;;  %v256_v7 = vld [vmem:[%s1067_s15 + $0xd0] sm:$0xff]  ;;  %213 = vst.msk [vmem:[#allocation2 + $0x78] sm:$0xff] %vm197_vm0, %v946_v16 }
  0x22   : > { %771 = vmatpush3.bf16.msra.mxu0 %v770_v32  ;;  %796 = vmatpush3.bf16.msra.mxu1 %v770_v32  ;;  %v243_v8 = vld [vmem:[%s1067_s15 + $0x68] sm:$0xff]  ;;  %v242_v10 = vld [vmem:[%s1067_s15 + $0x60] sm:$0xff]  ;;  %v245_v12 = vld [vmem:[%s1067_s15 + $0x78] sm:$0xff] }
  0x23   : > { %773 = vmatprep.subr.bf16.mxu0 %v772_v34  ;;  %789 = vmatprep.subr.bf16.mxu1 %v772_v34  ;;  %v259_v9 = vld [vmem:[%s1067_s15 + $0xe8] sm:$0xff]  ;;  %v258_v11 = vld [vmem:[%s1067_s15 + $0xe0] sm:$0xff]  ;;  %v261_v13 = vld [vmem:[%s1067_s15 + $0xf8] sm:$0xff] }
  0x24   : > { %v244_v14 = vld [vmem:[%s1067_s15 + $0x70] sm:$0xff]  ;;  %v214_v19 = vld [vmem:[#allocation2] sm:$0xff]  ;;  %v215_v29 = vld [vmem:[#allocation2 + $0x8] sm:$0xff] }
  0x25   : > { %v260_v15 = vld [vmem:[%s1067_s15 + $0xf0] sm:$0xff]  ;;  %v222_v21 = vld [vmem:[#allocation2 + $0x40] sm:$0xff]  ;;  %v223_v31 = vld [vmem:[#allocation2 + $0x48] sm:$0xff]  ;;  %s173_s15 = sand.u32 1, %s928_s10  }
  0x26   : > { %775 = vmatpush3.bf16.msra.mxu0 %v774_v39  ;;  %797 = vmatpush3.bf16.msra.mxu1 %v774_v39  ;;  %v216_v39 = vld [vmem:[#allocation2 + $0x10] sm:$0xff]  ;;  %s662_s20 = sshll.u32 %s173_s15, 4  ;;  %s1196_s29 = scalar_lea.sflag [#allocation4], %s173_s15 }
  0x27   : > { %777 = vmatprep.subr.bf16.mxu0 %v776_v40  ;;  %790 = vmatprep.subr.bf16.mxu1 %v776_v40  ;;  %v224_v41 = vld [vmem:[#allocation2 + $0x50] sm:$0xff]  ;;  %s175_s24 = scalar_lea.vmem [#allocation3], %s662_s20 }
  0x28   : > { %s565_s25 = sshll.u32 %s175_s24, 4  ;;  %s1194_s25 = int_to_ptr.vmem [resolvable:$true] %s565_s25 }
  0x29   : > { %s866_s30 = scalar_lea.vmem %s1194_s25, 256  ;;  %p873_p1 = scmp.lt.s32.totalorder %s1194_s25, %s871_s3 }
  0x2a   : > { %779 = vmatpush3.bf16.msra.mxu0 %v778_v45  ;;  %798 = vmatpush3.bf16.msra.mxu1 %v778_v45  ;;  %p867_p12 = scmp.ne.s32.totalorder %s1194_s25, %s866_s30  ;;  %p874_p2 = scmp.lt.s32.totalorder %s872_s4, %s866_s30 }
  0x2b   : > { %781 = vmatprep.subr.bf16.mxu0 %v780_v46  ;;  %791 = vmatprep.subr.bf16.mxu1 %v780_v46 }
  0x2c   : > { %p868_p13 = pnand %p867_p12, %p1005_p4  ;;  %p875_p3 = por %p874_p2, %p873_p1 }
  0x2e   : > { %783 = vmatpush3.bf16.msra.mxu0 %v782_v49  ;;  %799 = vmatpush3.bf16.msra.mxu1 %v782_v49  ;;  %v217_v49 = vld [vmem:[#allocation2 + $0x18] sm:$0xff]  ;;  %p869_p0 = pneg %p868_p13 }
  0x30   : > { %p876_p5 = pnand %p875_p3, %p869_p0 }
  0x31   : > { %359 = vmatmul.mubr.f32.vlgmr.msra.gmra.mrb[0].mxu0 %v230_v50  ;;  %399 = vmatmul.mubr.f32.vlgmr.msra.gmra.mrb[0].mxu1 %v246_v51 }
  0x32   : > { %363 = vmatprep.mubr.f32.mxu0 %v233_v52  ;;  %403 = vmatprep.mubr.f32.mxu1 %v249_v53  ;;  %v225_v52 = vld [vmem:[#allocation2 + $0x58] sm:$0xff] }
  0x35   : > { %364 = vmatmul.mubr.f32.gmra.mrb[2].mxu0 %v232_v54  ;;  %404 = vmatmul.mubr.f32.gmra.mrb[2].mxu1 %v248_v55 }
  0x36   : > { %368 = vmatprep.mubr.f32.mxu0 %v235_v56  ;;  %408 = vmatprep.mubr.f32.mxu1 %v251_v57 }
  0x39   : > { %369 = vmatmul.mubr.f32.gmra.mrb[4].mxu0 %v234_v58  ;;  %409 = vmatmul.mubr.f32.gmra.mrb[4].mxu1 %v250_v59 }
  0x3a   : > { %373 = vmatprep.mubr.f32.mxu0 %v237_v60  ;;  %413 = vmatprep.mubr.f32.mxu1 %v253_v61  ;;  %v218_v60 = vld [vmem:[#allocation2 + $0x20] sm:$0xff] }
  0x3d   : > { %374 = vmatmul.mubr.f32.gmra.mrb[6].mxu0 %v236_v62  ;;  %414 = vmatmul.mubr.f32.gmra.mrb[6].mxu1 %v252_v63  ;;  %v226_v63 = vld [vmem:[#allocation2 + $0x60] sm:$0xff] }
  0x3e   : > { %378 = vmatprep.mubr.f32.mxu0 %v239_v0  ;;  %418 = vmatprep.mubr.f32.mxu1 %v255_v1 }
  0x41   : > { %379 = vmatmul.mubr.f32.gmra.mrb[8].mxu0 %v238_v2  ;;  %419 = vmatmul.mubr.f32.gmra.mrb[8].mxu1 %v254_v3 }
  0x42   : > { %383 = vmatprep.mubr.f32.mxu0 %v241_v4  ;;  %423 = vmatprep.mubr.f32.mxu1 %v257_v5 }
  0x45   : > { %384 = vmatmul.mubr.f32.gmra.mrb[10].mxu0 %v240_v6  ;;  %424 = vmatmul.mubr.f32.gmra.mrb[10].mxu1 %v256_v7  ;;  %v219_v7 = vld [vmem:[#allocation2 + $0x28] sm:$0xff] }
  0x46   : > { %388 = vmatprep.mubr.f32.mxu0 %v243_v8  ;;  %428 = vmatprep.mubr.f32.mxu1 %v259_v9 }
  0x49   : > { %389 = vmatmul.mubr.f32.gmra.mrb[12].mxu0 %v242_v10  ;;  %429 = vmatmul.mubr.f32.gmra.mrb[12].mxu1 %v258_v11  ;;  %v227_v10 = vld [vmem:[#allocation2 + $0x68] sm:$0xff] }
  0x4a   : > { %393 = vmatprep.mubr.f32.mxu0 %v245_v12  ;;  %433 = vmatprep.mubr.f32.mxu1 %v261_v13 }
  0x4d   : > { %394 = vmatmul.mubr.f32.gmra.mrb[14].mxu0 %v244_v14  ;;  %434 = vmatmul.mubr.f32.gmra.mrb[14].mxu1 %v260_v15 }
 0x104   : > { %v704_v17 = vpop.f32.mrb[0].mxu0  ;;  %v728_v18 = vpop.f32.mrb[0].mxu1 }
 0x105   : > { %v705_v20 = vpop.f32.mrb[1].mxu0  ;;  %v729_v22 = vpop.f32.mrb[1].mxu1 }
 0x106   : > { %v706_v23 = vadd.f32 %v705_v20, %v704_v17  ;;  %v730_v24 = vadd.f32 %v729_v22, %v728_v18  ;;  %v220_v18 = vld [vmem:[#allocation2 + $0x30] sm:$0xff] }
 0x108   : > { %v439_v25 = vadd.f32 %v706_v23, %v214_v19  ;;  %v707_v26 = vpop.f32.mrb[2].mxu0  ;;  %v447_v27 = vadd.f32 %v730_v24, %v222_v21  ;;  %v731_v28 = vpop.f32.mrb[2].mxu1  ;;  %v228_v21 = vld [vmem:[#allocation2 + $0x70] sm:$0xff] }
 0x109   : > { %v708_v30 = vpop.f32.mrb[3].mxu0  ;;  %v732_v32 = vpop.f32.mrb[3].mxu1 }
 0x10a   : > { %456 = vst.msk [vmem:[#allocation2] sm:$0xff] %vm197_vm0, %v439_v25  ;;  %v709_v33 = vadd.f32 %v708_v30, %v707_v26  ;;  %464 = vst.msk [vmem:[#allocation2 + $0x40] sm:$0xff] %vm197_vm0, %v447_v27  ;;  %v733_v34 = vadd.f32 %v732_v32, %v731_v28  ;;  %v229_v32 = vld [vmem:[#allocation2 + $0x78] sm:$0xff] }
 0x10c   : > { %v440_v35 = vadd.f32 %v709_v33, %v215_v29  ;;  %v710_v36 = vpop.f32.mrb[4].mxu0  ;;  %v448_v37 = vadd.f32 %v733_v34, %v223_v31  ;;  %v734_v38 = vpop.f32.mrb[4].mxu1  ;;  %v221_v29 = vld [vmem:[#allocation2 + $0x38] sm:$0xff] }
 0x10d   : > { %v711_v40 = vpop.f32.mrb[5].mxu0  ;;  %v735_v42 = vpop.f32.mrb[5].mxu1 }
 0x10e   : > { %457 = vst.msk [vmem:[#allocation2 + $0x8] sm:$0xff] %vm197_vm0, %v440_v35  ;;  %v712_v43 = vadd.f32 %v711_v40, %v710_v36  ;;  %465 = vst.msk [vmem:[#allocation2 + $0x48] sm:$0xff] %vm197_vm0, %v448_v37  ;;  %v736_v44 = vadd.f32 %v735_v42, %v734_v38 }
 0x110   : > { %v441_v45 = vadd.f32 %v712_v43, %v216_v39  ;;  %v713_v46 = vpop.f32.mrb[6].mxu0  ;;  %v449_v47 = vadd.f32 %v736_v44, %v224_v41  ;;  %v737_v48 = vpop.f32.mrb[6].mxu1 }
 0x111   : > { %v714_v50 = vpop.f32.mrb[7].mxu0  ;;  %v475_v51 = vld [vmem:[#allocation2] sm:$0xff]  ;;  %v738_v53 = vpop.f32.mrb[7].mxu1 }
 0x112   : > { %458 = vst.msk [vmem:[#allocation2 + $0x10] sm:$0xff] %vm197_vm0, %v441_v45  ;;  %v715_v54 = vadd.f32 %v714_v50, %v713_v46  ;;  %491 = vxpose.xlu0.b32.start [1/16] (narrow) %v475_v51, 16  ;;  %466 = vst.msk [vmem:[#allocation2 + $0x50] sm:$0xff] %vm197_vm0, %v449_v47  ;;  %v739_v55 = vadd.f32 %v738_v53, %v737_v48  ;;  %v483_v41 = vld [vmem:[#allocation2 + $0x40] sm:$0xff] }
 0x114   : > { %v442_v56 = vadd.f32 %v715_v54, %v217_v49  ;;  %v716_v57 = vpop.f32.mrb[8].mxu0  ;;  %v450_v58 = vadd.f32 %v739_v55, %v225_v52  ;;  %v740_v59 = vpop.f32.mrb[8].mxu1 }
 0x115   : > { %v717_v61 = vpop.f32.mrb[9].mxu0  ;;  %v476_v62 = vld [vmem:[#allocation2 + $0x8] sm:$0xff]  ;;  %v741_v0 = vpop.f32.mrb[9].mxu1 }
 0x116   : > { %459 = vst.msk [vmem:[#allocation2 + $0x18] sm:$0xff] %vm197_vm0, %v442_v56  ;;  %v718_v1 = vadd.f32 %v717_v61, %v716_v57  ;;  %492 = vxpose.xlu0.b32.cont [2/16] (narrow) %v476_v62, 16  ;;  %467 = vst.msk [vmem:[#allocation2 + $0x58] sm:$0xff] %vm197_vm0, %v450_v58  ;;  %v742_v2 = vadd.f32 %v741_v0, %v740_v59  ;;  %v484_v42 = vld [vmem:[#allocation2 + $0x48] sm:$0xff] }
 0x118   : > { %v443_v3 = vadd.f32 %v718_v1, %v218_v60  ;;  %v719_v4 = vpop.f32.mrb[10].mxu0  ;;  %v451_v5 = vadd.f32 %v742_v2, %v226_v63  ;;  %v743_v6 = vpop.f32.mrb[10].mxu1 }
 0x119   : > { %v720_v8 = vpop.f32.mrb[11].mxu0  ;;  %v477_v9 = vld [vmem:[#allocation2 + $0x10] sm:$0xff]  ;;  %v744_v11 = vpop.f32.mrb[11].mxu1 }
 0x11a   : > { %460 = vst.msk [vmem:[#allocation2 + $0x20] sm:$0xff] %vm197_vm0, %v443_v3  ;;  %v721_v12 = vadd.f32 %v720_v8, %v719_v4  ;;  %493 = vxpose.xlu0.b32.cont [3/16] (narrow) %v477_v9, 16  ;;  %468 = vst.msk [vmem:[#allocation2 + $0x60] sm:$0xff] %vm197_vm0, %v451_v5  ;;  %v745_v13 = vadd.f32 %v744_v11, %v743_v6  ;;  %v485_v43 = vld [vmem:[#allocation2 + $0x50] sm:$0xff] }
 0x11c   : > { %v444_v14 = vadd.f32 %v721_v12, %v219_v7  ;;  %v722_v15 = vpop.f32.mrb[12].mxu0  ;;  %v452_v16 = vadd.f32 %v745_v13, %v227_v10  ;;  %v746_v17 = vpop.f32.mrb[12].mxu1 }
 0x11d   : > { %v723_v19 = vpop.f32.mrb[13].mxu0  ;;  %v478_v20 = vld [vmem:[#allocation2 + $0x18] sm:$0xff]  ;;  %v747_v22 = vpop.f32.mrb[13].mxu1 }
 0x11e   : > { %461 = vst.msk [vmem:[#allocation2 + $0x28] sm:$0xff] %vm197_vm0, %v444_v14  ;;  %v724_v23 = vadd.f32 %v723_v19, %v722_v15  ;;  %494 = vxpose.xlu0.b32.cont [4/16] (narrow) %v478_v20, 16  ;;  %469 = vst.msk [vmem:[#allocation2 + $0x68] sm:$0xff] %vm197_vm0, %v452_v16  ;;  %v748_v24 = vadd.f32 %v747_v22, %v746_v17  ;;  %v486_v44 = vld [vmem:[#allocation2 + $0x58] sm:$0xff] }
 0x120   : > { %v445_v25 = vadd.f32 %v724_v23, %v220_v18  ;;  %v725_v26 = vpop.f32.mrb[14].mxu0  ;;  %v453_v27 = vadd.f32 %v748_v24, %v228_v21  ;;  %v749_v28 = vpop.f32.mrb[14].mxu1 }
 0x121   : > { %v726_v30 = vpop.f32.mrb[15].mxu0  ;;  %v479_v31 = vld [vmem:[#allocation2 + $0x20] sm:$0xff]  ;;  %v750_v33 = vpop.f32.mrb[15].mxu1 }
 0x122   : > { %462 = vst.msk [vmem:[#allocation2 + $0x30] sm:$0xff] %vm197_vm0, %v445_v25  ;;  %v727_v34 = vadd.f32 %v726_v30, %v725_v26  ;;  %495 = vxpose.xlu0.b32.cont [5/16] (narrow) %v479_v31, 16  ;;  %470 = vst.msk [vmem:[#allocation2 + $0x70] sm:$0xff] %vm197_vm0, %v453_v27  ;;  %v751_v35 = vadd.f32 %v750_v33, %v749_v28  ;;  %v487_v45 = vld [vmem:[#allocation2 + $0x60] sm:$0xff] }
 0x124   : > { %v446_v36 = vadd.f32 %v727_v34, %v221_v29  ;;  %v454_v37 = vadd.f32 %v751_v35, %v229_v32 }
 0x125   : > { %v480_v38 = vld [vmem:[#allocation2 + $0x28] sm:$0xff] }
 0x126   : > { %463 = vst.msk [vmem:[#allocation2 + $0x38] sm:$0xff] %vm197_vm0, %v446_v36  ;;  %496 = vxpose.xlu0.b32.cont [6/16] (narrow) %v480_v38, 16  ;;  %471 = vst.msk [vmem:[#allocation2 + $0x78] sm:$0xff] %vm197_vm0, %v454_v37  ;;  %v488_v46 = vld [vmem:[#allocation2 + $0x68] sm:$0xff] }
 0x129   : > { %v481_v39 = vld [vmem:[#allocation2 + $0x30] sm:$0xff] }
 0x12a   : > { %497 = vxpose.xlu0.b32.cont [7/16] (narrow) %v481_v39, 16  ;;  %v489_v47 = vld [vmem:[#allocation2 + $0x70] sm:$0xff] }
 0x12d   : > { %v482_v40 = vld [vmem:[#allocation2 + $0x38] sm:$0xff] }
 0x12e   : > { %498 = vxpose.xlu0.b32.cont [8/16] (narrow) %v482_v40, 16  ;;  %v490_v48 = vld [vmem:[#allocation2 + $0x78] sm:$0xff] }
 0x132   : > { %499 = vxpose.xlu0.b32.cont [9/16] (narrow) %v483_v41, 16 }
 0x136   : > { %500 = vxpose.xlu0.b32.cont [10/16] (narrow) %v484_v42, 16 }
 0x13a   : > { %501 = vxpose.xlu0.b32.cont [11/16] (narrow) %v485_v43, 16 }
 0x13e   : > { %502 = vxpose.xlu0.b32.cont [12/16] (narrow) %v486_v44, 16 }
 0x142   : > { %503 = vxpose.xlu0.b32.cont [13/16] (narrow) %v487_v45, 16 }
 0x146   : > { %504 = vxpose.xlu0.b32.cont [14/16] (narrow) %v488_v46, 16 }
 0x14a   : > { %505 = vxpose.xlu0.b32.cont [15/16] (narrow) %v489_v47, 16 }
 0x14e   : > { %506 = vxpose.xlu0.b32.end [16/16] (narrow) %v490_v48, 16 }
 0x192   : > { %v507_v49 = vpop.trf.xlu0 }
 0x193   : > { %v523_v50 = vmul.f32 %v507_v49, %v507_v49 }
 0x195   : > { %525 = vadd.xlane.f32.xlu1 %v523_v50 }
 0x196   : > { %v508_v51 = vpop.trf.xlu0 }
 0x197   : > { %v524_v52 = vmul.f32 %v508_v51, %v508_v51 }
 0x199   : > { %527 = vadd.xlane.f32.xlu1 %v524_v52 }
 0x222   : > { %v526_v53 = vpop.xlane.xlu1 %525 }
 0x223   : > { %858 = vrsqrt.f32 %v526_v53  ;;  %vm531_vm1 = vcmp.eq.f32.partialorder %v526_v53, inf  ;;  %v534_v57 = vand.u32 2147483648, %v526_v53  ;;  %vm533_vm2 = vcmp.eq.f32.partialorder %v526_v53, 0.0 }
 0x226   : > { %v528_v54 = vpop.xlane.xlu1 %527 }
 0x227   : > { %860 = vrsqrt.f32 %v528_v54  ;;  %vm538_vm3 = vcmp.eq.f32.partialorder %v528_v54, inf  ;;  %v541_v63 = vand.u32 2147483648, %v528_v54  ;;  %vm540_vm4 = vcmp.eq.f32.partialorder %v528_v54, 0.0 }
 0x22d   : > { %v859_v55 = vpop.eup %858 }
 0x22e   : > { %v530_v56 = vmul.f32 %v859_v55, %v526_v53 }
 0x230   : > { %v532_v58 = vsel %vm531_vm1, %v526_v53, %v530_v56 }
 0x231   : > { %v861_v59 = vpop.eup %860  ;;  %v535_v60 = vsel %vm533_vm2, %v534_v57, %v532_v58 }
 0x232   : > { %v543_v61 = vadd.f32 1e-07, %v535_v60  ;;  %v537_v62 = vmul.f32 %v861_v59, %v528_v54 }
 0x234   : > { %862 = vrcp.f32 %v543_v61  ;;  %v539_v0 = vsel %vm538_vm3, %v528_v54, %v537_v62 }
 0x235   : > { %v542_v1 = vsel %vm540_vm4, %v541_v63, %v539_v0 }
 0x236   : > { %v544_v2 = vadd.f32 1e-07, %v542_v1 }
 0x238   : > { %864 = vrcp.f32 %v544_v2 }
 0x23e   : > { %v863_v3 = vpop.eup %862 }
 0x23f   : > { %v547_v4 = vmul.f32 %v863_v3, %v507_v49 }
 0x241   : > { %549 = vst [vmem:[%s175_s24] sm:$0xff] %v547_v4 }
 0x242   : > { %v865_v5 = vpop.eup %864 }
 0x243   : > { %v548_v6 = vmul.f32 %v865_v5, %v508_v51 }
 0x245   : > { %550 = vst [vmem:[%s175_s24 + $0x8] sm:$0xff] %v548_v6 }
 0x246   : > { %879 = shalt.err (!%p876_p5)
}
 0x247   : > { %s880_s5 = scalar_lea.hbm %s1192_s28, 256  ;;  %s884_s8 = scalar_lea.hbm %s1244_s2, 512 }
 0x248   : > { %p881_p6 = scmp.ne.s32.totalorder %s1192_s28, %s880_s5  ;;  %p885_p10 = scmp.lt.u32.totalorder %s1192_s28, %s1244_s2 }
 0x249   : > { %p886_p11 = scmp.lt.u32.totalorder %s884_s8, %s880_s5  ;;  %p888_p13 = scmp.lt.u32.totalorder %s880_s5, %s1192_s28 }
 0x24a   : > { %p882_p7 = pnand %p881_p6, %p1005_p4 }
 0x24b   : > { %p887_p12 = por %p886_p11, %p885_p10 }
 0x24c   : > { %p883_p9 = pneg %p882_p7 }
 0x24d   : > { %p889_p0 = por %p888_p13, %p887_p12 }
 0x24f   : > { %p890_p1 = pnand %p889_p0, %p883_p9 }
 0x251   : > { %893 = shalt.err (!%p890_p1)
}
 0x252   : > { %s948_s15 = smov 128   ;;  %s949_s20 = smov 8  }
 0x253   : > { %800 = dma.vmem_to_hbm [thread:$0]  (%p1005_p4), %s1194_s25, 256, %s1192_s28, %s1196_s29, %s948_s15, %s948_s15, %s949_s20  }
 0x254 PF: > { %p806_p2 = scmp.ge.s32.totalorder %s944_s14, 2  ;;  %s580_s23 = sand.u32 1, %s924_s9  }
 0x255   : > { %s581_s24 = scalar_lea.sflag [#allocation4], %s580_s23 }
 0x256   : > { %p803_p3 = pnand %p806_p2, %p1012_p8 }
 0x258   : > { %919 = dma.done.wait (!%p803_p3), %s581_s24, 256  }
 0x259   : > { %921 = vsyncadd (!%p803_p3), %s581_s24, 4294967040  ;;  %s15_s14 = sadd.s32 1, %s944_s14   ;;  %s1247_s9 = smov %s928_s10 }
 0x25a   : > { %p12_p5 = scmp.ge.s32.totalorder %s15_s14, 4   ;;  %s1248_s10 = smov %s932_s11 }
 0x25b   : > { %s1249_s11 = smov %s1018_s22  ;;  %s1250_s12 = smov %s940_s13 }
 0x25c   : > { %s1251_s13 = smov %s1253_s17  ;;  %14 = sbr.rel (!%p12_p5) target bundleno = 4 (0x4), region = 74 }
 0x263   :  { %586 = vsyncpa [#allocation4], 1 }
 0x264   :  { %588 = vsyncpa [#allocation4 + $0x1], 1 }

</bundles_post_ra>
